<compile_context>
chip_gen: v7x
topology: tpu7x:2x2x1
jax: 0.10.0
libtpu: 0.0.40
codegen_flags: <defaults>
</compile_context>

<pallas_src>
import functools
import math

import jax
import jax.numpy as jnp
from jax.experimental import pallas as pl
from jax.experimental.pallas import tpu as pltpu

_INV_SQRT2 = 0.7071067811865476


def _samples_per_step(N, H, target_rows=512, min_steps=2):
    """Whole samples per grid step: aim for M = nb*H >= target_rows MXU rows,
    but keep >= min_steps grid steps (v7x has 2 TensorCores) and divide N."""
    nb = max(1, min(N, -(-target_rows // H)))
    while nb > 1 and (N % nb != 0 or N // nb < min_steps):
        nb -= 1
    return nb


# ---------------------------------------------------------------------------
# Pass 1: fused-im2col conv as ONE banded MXU matmul (bf16 operands, f32
#         accumulate) + packed per-step partial sums / sums-of-squares for BN.
# ---------------------------------------------------------------------------
def conv_stats_kernel(x_ref, wb_ref, y_ref, stats_ref, *, K, H):
    """Per grid step (= N_blk whole samples):

    x_ref    : [N_blk, Hp, Wp*Cin]   bf16  padded samples, channel-interleaved rows
    wb_ref   : [K*Wp*Cin, W*Cout]    bf16  flattened block-Toeplitz conv weights
    y_ref    : [N_blk*H, W*Cout]     bf16  pre-bias conv output (lane-dense)
    stats_ref: [8, W*Cout]           f32   row 0 = sum, row 1 = sum of squares
    """
    nb, _, RC = x_ref.shape
    OC = y_ref.shape[-1]

    # Lane-concatenate the K row-shifted views -> one [M, K*RC] slab, so the
    # whole conv is a single MXU matmul of contraction depth K*RC (216 here)
    # instead of K depth-72 matmuls + VPU adds (review #1).  (n, h) is
    # flattened into the M dimension (review #2).
    pieces = [x_ref[:, ky:ky + H, :].reshape(nb * H, RC) for ky in range(K)]
    slab = jnp.concatenate(pieces, axis=-1)                        # [M, K*RC] bf16
    acc = jnp.dot(slab, wb_ref[...], preferred_element_type=jnp.float32)

    y_ref[...] = acc.astype(y_ref.dtype)

    # Partial batch statistics of the PRE-BIAS conv output (the bias is folded
    # exactly into the BN shift later).  Packed into a single 8-sublane block
    # so the store is one unmasked full-vreg vst (review #6).
    col_sum = jnp.sum(acc, axis=0, keepdims=True)                  # [1, OC]
    col_ssq = jnp.sum(acc * acc, axis=0, keepdims=True)            # [1, OC]
    pad = jnp.zeros((stats_ref.shape[0] - 2, OC), jnp.float32)
    stats_ref[...] = jnp.concatenate([col_sum, col_ssq, pad], axis=0)


# ---------------------------------------------------------------------------
# Pass 2: z = y * scale + shift (precomputed BN affine incl. conv bias),
#         then exact GELU.  Output aliases the y buffer.
# ---------------------------------------------------------------------------
def bn_gelu_kernel(y_ref, scale_ref, shift_ref, o_ref):
    z = y_ref[...].astype(jnp.float32) * scale_ref[...] + shift_ref[...]
    o_ref[...] = (0.5 * z * (1.0 + jax.lax.erf(z * _INV_SQRT2))).astype(o_ref.dtype)


# ---------------------------------------------------------------------------
# Wrapper
# ---------------------------------------------------------------------------
@jax.jit
def conv_block_forward(x, w, b, gamma, beta, eps=1e-5):
    N, Cin, H, W = x.shape
    Cout, _, K, _ = w.shape
    pad = 1
    Hp, Wp = H + 2 * pad, W + 2 * pad
    RC = Wp * Cin                  # width of one interleaved padded row
    OC = W * Cout                  # lane width of the conv output (128 here)

    N_blk = _samples_per_step(N, H)        # samples per grid step (reviews #2/#3)
    G = N // N_blk                         # grid steps (>= 2 when N allows)
    M = N_blk * H                          # MXU / store rows per step

    cp = pltpu.CompilerParams(
        dimension_semantics=("parallel",),         # no cross-step state
        vmem_limit_bytes=32 * 1024 * 1024)         # re-derive when H-banding (review #9)

    # ---- input prep: single pass over x (NCHW -> padded, row-interleaved) ----
    x_rows = jnp.transpose(x, (0, 2, 3, 1))                          # [N,H,W,Cin]
    x_rows = jnp.pad(x_rows, ((0, 0), (pad, pad), (pad, pad), (0, 0)))
    x_rows = x_rows.reshape(N, Hp, RC).astype(jnp.bfloat16)          # [N,Hp,RC]

    # ---- block-Toeplitz conv weights, flattened over ky (review #1):
    #      Wb[ky*RC + (w+kx)*Cin + c, w*Cout + o] = w[o, c, ky, kx]
    W2 = jnp.transpose(w, (2, 3, 1, 0)).astype(jnp.float32)          # [K,K,Cin,Cout]
    Wb = jnp.stack(
        [sum(jnp.kron(jnp.eye(Wp, W, k=-kx, dtype=jnp.float32), W2[ky, kx])
             for kx in range(K))
         for ky in range(K)], axis=0)                                # [K,RC,OC]
    Wb_flat = Wb.reshape(K * RC, OC).astype(jnp.bfloat16)            # [K*RC,OC]

    # ---- pass 1: conv (one MXU matmul per step) + packed BN stat partials ----
    kernel1 = functools.partial(conv_stats_kernel, K=K, H=H)
    y, stats = pl.pallas_call(
        kernel1,
        out_shape=(
            jax.ShapeDtypeStruct((N * H, OC), jnp.bfloat16),
            jax.ShapeDtypeStruct((G, 8, OC), jnp.float32),
        ),
        grid=(G,),
        in_specs=[
            pl.BlockSpec((N_blk, Hp, RC), lambda g: (g, 0, 0)),
            # Constant index_map -> DMA'd once; 55 KB here so default double
            # buffering is harmless (see TODO at top for the at-scale plan).
            pl.BlockSpec((K * RC, OC), lambda g: (0, 0)),
        ],
        out_specs=[
            pl.BlockSpec((M, OC), lambda g: (g, 0)),
            pl.BlockSpec((None, 8, OC), lambda g: (g, 0, 0)),
        ],
        compiler_params=cp,
    )(x_rows, Wb_flat)

    # ---- tiny [Cout]-sized glue: batch stats -> fused BN scale / shift ----
    m_total = jnp.float32(N * H * W)
    s = jnp.sum(stats[:, 0, :], axis=0).reshape(W, Cout).sum(axis=0)    # pre-bias sums
    ssq = jnp.sum(stats[:, 1, :], axis=0).reshape(W, Cout).sum(axis=0)
    mean_nb = s / m_total                                   # mean of pre-bias conv
    var = jnp.maximum(ssq / m_total - mean_nb * mean_nb, 0.0)        # biased variance
    mean = mean_nb + b                                      # batch mean incl. bias
    scale = gamma * jax.lax.rsqrt(var + eps)
    shift = beta + (b - mean) * scale                       # folds bias + BN affine
    scale_row = jnp.tile(scale, W).reshape(1, OC).astype(jnp.float32)
    shift_row = jnp.tile(shift, W).reshape(1, OC).astype(jnp.float32)

    # ---- pass 2: BN affine + exact GELU over (N*H, OC) row blocks (review #5),
    #      aliasing the y buffer ----
    out_rows = pl.pallas_call(
        bn_gelu_kernel,
        out_shape=jax.ShapeDtypeStruct((N * H, OC), jnp.bfloat16),
        grid=(G,),
        in_specs=[
            pl.BlockSpec((M, OC), lambda g: (g, 0)),
            pl.BlockSpec((1, OC), lambda g: (0, 0)),
            pl.BlockSpec((1, OC), lambda g: (0, 0)),
        ],
        out_specs=pl.BlockSpec((M, OC), lambda g: (g, 0)),
        input_output_aliases={0: 0},
        compiler_params=cp,
    )(y, scale_row, shift_row)

    # Back to NCHW; the f32 cast is fused into this one transpose (review #7).
    # Both transposes disappear if the surrounding network carries NHWC.
    out = (out_rows.reshape(N, H, W, Cout)
           .transpose(0, 3, 1, 2)
           .astype(jnp.float32))
    return out


# ---------------------------------------------------------------------------
# Pure-JAX reference (same semantics as the PyTorch module in training mode).
# ---------------------------------------------------------------------------
def reference(x, w, b, gamma, beta, eps=1e-5):
    y = jax.lax.conv_general_dilated(
        x, w, window_strides=(1, 1), padding=((1, 1), (1, 1)),
        dimension_numbers=('NCHW', 'OIHW', 'NCHW'))
    y = y + b[None, :, None, None]
    mean = jnp.mean(y, axis=(0, 2, 3), keepdims=True)
    var = jnp.mean((y - mean) ** 2, axis=(0, 2, 3), keepdims=True)
    z = (y - mean) * jax.lax.rsqrt(var + eps)
    z = z * gamma[None, :, None, None] + beta[None, :, None, None]
    return 0.5 * z * (1.0 + jax.lax.erf(z / jnp.sqrt(2.0)))


if __name__ == "__main__":
    key = jax.random.PRNGKey(0)
    kx_, kw_, kb_, kg_, kbe_ = jax.random.split(key, 5)

    N, Cin, H, W = 2, 4, 16, 16
    Cout, K = 8, 3

    x = jax.random.normal(kx_, (N, Cin, H, W), dtype=jnp.float32)
    fan_in = Cin * K * K
    w = jax.random.normal(kw_, (Cout, Cin, K, K), dtype=jnp.float32) / math.sqrt(fan_in)
    b = jax.random.normal(kb_, (Cout,), dtype=jnp.float32) * 0.1
    gamma = 1.0 + 0.1 * jax.random.normal(kg_, (Cout,), dtype=jnp.float32)
    beta = 0.1 * jax.random.normal(kbe_, (Cout,), dtype=jnp.float32)

    out = conv_block_forward(x, w, b, gamma, beta)
    out = jax.block_until_ready(out)

    ref = reference(x, w, b, gamma, beta)
    assert out.shape == (N, Cout, H, W)
    err = float(jnp.max(jnp.abs(out - ref)))
    # bf16 MXU operands + bf16 y/out buffers -> allow ~3e-2 slack vs f32 ref.
    assert jnp.allclose(out, ref, rtol=3e-2, atol=3e-2), err

    print("KERNEL_OK")
</pallas_src>

<mosaic_0001>
module attributes {stable_mosaic.version = 11 : i64} {
  func.func @conv_stats_kernel(%arg0: i32, %arg1: memref<1x18x72xbf16, #tpu.memory_space<vmem>>, %arg2: memref<216x128xbf16, #tpu.memory_space<vmem>>, %arg3: memref<16x128xbf16, #tpu.memory_space<vmem>>, %arg4: memref<1x8x128xf32, #tpu.memory_space<vmem>>) attributes {dimension_semantics = [#tpu.dimension_semantics<parallel>], iteration_bounds = array<i64: 2>, scalar_prefetch = 0 : i64, scratch_operands = 0 : i64, tpu.core_type = #tpu.core_type<tc>, window_params = [{transform_indices = @transform_0, window_bounds = array<i64: 1, 18, 72>}, {pipeline_mode = #tpu.pipeline_mode<synchronous>, transform_indices = @transform_1, window_bounds = array<i64: 216, 128>}, {transform_indices = @transform_2, window_bounds = array<i64: 16, 128>}, {transform_indices = @transform_3, window_bounds = array<i64: 1, 8, 128>}]} {
    %c0 = arith.constant 0 : index
    %c0_0 = arith.constant 0 : index
    %c0_1 = arith.constant 0 : index
    %0 = vector.load %arg1[%c0, %c0_0, %c0_1] : memref<1x18x72xbf16, #tpu.memory_space<vmem>>, vector<1x16x72xbf16>
    %1 = vector.shape_cast %0 : vector<1x16x72xbf16> to vector<16x72xbf16>
    %c0_2 = arith.constant 0 : index
    %c1 = arith.constant 1 : index
    %c0_3 = arith.constant 0 : index
    %2 = vector.load %arg1[%c0_2, %c1, %c0_3] : memref<1x18x72xbf16, #tpu.memory_space<vmem>>, vector<1x16x72xbf16>
    %3 = vector.shape_cast %2 : vector<1x16x72xbf16> to vector<16x72xbf16>
    %c0_4 = arith.constant 0 : index
    %c2 = arith.constant 2 : index
    %c0_5 = arith.constant 0 : index
    %4 = vector.load %arg1[%c0_4, %c2, %c0_5] : memref<1x18x72xbf16, #tpu.memory_space<vmem>>, vector<1x16x72xbf16>
    %5 = vector.shape_cast %4 : vector<1x16x72xbf16> to vector<16x72xbf16>
    %6 = tpu.concatenate %1, %3, %5 in 1 : vector<16x72xbf16>, vector<16x72xbf16>, vector<16x72xbf16> -> vector<16x216xbf16>
    %c0_6 = arith.constant 0 : index
    %c0_7 = arith.constant 0 : index
    %7 = vector.load %arg2[%c0_6, %c0_7] : memref<216x128xbf16, #tpu.memory_space<vmem>>, vector<216x128xbf16>
    %cst = arith.constant dense<0.000000e+00> : vector<16x128xf32>
    %8 = tpu.matmul %6, %7, %cst {dimension_numbers = #tpu.dot_dimension_numbers<[1], [0], [0], [1], [0, 0, 1, 1], [], []>} : vector<16x216xbf16>, vector<216x128xbf16>, vector<16x128xf32> -> vector<16x128xf32>
    %9 = arith.truncf %8 : vector<16x128xf32> to vector<16x128xbf16>
    %c0_8 = arith.constant 0 : index
    %c0_9 = arith.constant 0 : index
    %10 = vector.load %arg3[%c0_8, %c0_9] : memref<16x128xbf16, #tpu.memory_space<vmem>>, vector<16x128xbf16>
    tpu.vector_store %arg3[%c0_8, %c0_9], %9 {strides = array<i32>} : memref<16x128xbf16, #tpu.memory_space<vmem>>, vector<16x128xbf16>,
    %cst_10 = arith.constant dense<0.000000e+00> : vector<128xf32>
    %11 = vector.multi_reduction <add>, %8, %cst_10 [0] : vector<16x128xf32> to vector<128xf32>
    %12 = vector.shape_cast %11 : vector<128xf32> to vector<1x128xf32>
    %13 = arith.mulf %8, %8 : vector<16x128xf32>
    %cst_11 = arith.constant dense<0.000000e+00> : vector<128xf32>
    %14 = vector.multi_reduction <add>, %13, %cst_11 [0] : vector<16x128xf32> to vector<128xf32>
    %15 = vector.shape_cast %14 : vector<128xf32> to vector<1x128xf32>
    %cst_12 = arith.constant 0.000000e+00 : f32
    %16 = vector.broadcast %cst_12 : f32 to vector<6x128xf32>
    %17 = tpu.concatenate %12, %15, %16 in 0 : vector<1x128xf32>, vector<1x128xf32>, vector<6x128xf32> -> vector<8x128xf32>
    %c0_13 = arith.constant 0 : index
    %c0_14 = arith.constant 0 : index
    %c0_15 = arith.constant 0 : index
    %18 = vector.load %arg4[%c0_13, %c0_14, %c0_15] : memref<1x8x128xf32, #tpu.memory_space<vmem>>, vector<1x8x128xf32>
    %19 = vector.shape_cast %18 : vector<1x8x128xf32> to vector<8x128xf32>
    %20 = vector.shape_cast %17 : vector<8x128xf32> to vector<1x8x128xf32>
    tpu.vector_store %arg4[%c0_13, %c0_14, %c0_15], %20 {strides = array<i32>} : memref<1x8x128xf32, #tpu.memory_space<vmem>>, vector<1x8x128xf32>,
    return
  }
  func.func @transform_0(%arg0: i32) -> (i32, i32, i32) {
    %c0_i32 = arith.constant 0 : i32
    %c0_i32_0 = arith.constant 0 : i32
    %c0_i32_1 = arith.constant 0 : i32
    return %arg0, %c0_i32, %c0_i32_0 : i32, i32, i32
  }
  func.func @transform_1(%arg0: i32) -> (i32, i32) {
    %c0_i32 = arith.constant 0 : i32
    %c0_i32_0 = arith.constant 0 : i32
    %c0_i32_1 = arith.constant 0 : i32
    return %c0_i32, %c0_i32_0 : i32, i32
  }
  func.func @transform_2(%arg0: i32) -> (i32, i32) {
    %c0_i32 = arith.constant 0 : i32
    %c0_i32_0 = arith.constant 0 : i32
    return %arg0, %c0_i32 : i32, i32
  }
  func.func @transform_3(%arg0: i32) -> (i32, i32, i32) {
    %c0_i32 = arith.constant 0 : i32
    %c0_i32_0 = arith.constant 0 : i32
    %c0_i32_1 = arith.constant 0 : i32
    return %arg0, %c0_i32, %c0_i32_0 : i32, i32, i32
  }
}

module attributes {stable_mosaic.version = 11 : i64} {
  func.func @bn_gelu_kernel(%arg0: i32, %arg1: memref<16x128xbf16, #tpu.memory_space<vmem>>, %arg2: memref<1x128xf32, #tpu.memory_space<vmem>>, %arg3: memref<1x128xf32, #tpu.memory_space<vmem>>, %arg4: memref<16x128xbf16, #tpu.memory_space<vmem>>) attributes {dimension_semantics = [#tpu.dimension_semantics<parallel>], iteration_bounds = array<i64: 2>, scalar_prefetch = 0 : i64, scratch_operands = 0 : i64, tpu.core_type = #tpu.core_type<tc>, window_params = [{transform_indices = @transform_0, window_bounds = array<i64: 16, 128>}, {pipeline_mode = #tpu.pipeline_mode<synchronous>, transform_indices = @transform_1, window_bounds = array<i64: 1, 128>}, {pipeline_mode = #tpu.pipeline_mode<synchronous>, transform_indices = @transform_2, window_bounds = array<i64: 1, 128>}, {transform_indices = @transform_3, window_bounds = array<i64: 16, 128>}]} {
    %c0 = arith.constant 0 : index
    %c0_0 = arith.constant 0 : index
    %0 = vector.load %arg1[%c0, %c0_0] : memref<16x128xbf16, #tpu.memory_space<vmem>>, vector<16x128xbf16>
    %1 = arith.extf %0 : vector<16x128xbf16> to vector<16x128xf32>
    %c0_1 = arith.constant 0 : index
    %c0_2 = arith.constant 0 : index
    %2 = vector.load %arg2[%c0_1, %c0_2] : memref<1x128xf32, #tpu.memory_space<vmem>>, vector<1x128xf32>
    %3 = vector.broadcast %2 : vector<1x128xf32> to vector<16x128xf32>
    %4 = arith.mulf %1, %3 : vector<16x128xf32>
    %c0_3 = arith.constant 0 : index
    %c0_4 = arith.constant 0 : index
    %5 = vector.load %arg3[%c0_3, %c0_4] : memref<1x128xf32, #tpu.memory_space<vmem>>, vector<1x128xf32>
    %6 = vector.broadcast %5 : vector<1x128xf32> to vector<16x128xf32>
    %7 = arith.addf %4, %6 : vector<16x128xf32>
    %cst = arith.constant 5.000000e-01 : f32
    %8 = vector.broadcast %cst : f32 to vector<16x128xf32>
    %9 = arith.mulf %8, %7 : vector<16x128xf32>
    %cst_5 = arith.constant 0.707106769 : f32
    %10 = vector.broadcast %cst_5 : f32 to vector<16x128xf32>
    %11 = arith.mulf %7, %10 : vector<16x128xf32>
    %12 = math.erf %11 : vector<16x128xf32>
    %cst_6 = arith.constant 1.000000e+00 : f32
    %13 = vector.broadcast %cst_6 : f32 to vector<16x128xf32>
    %14 = arith.addf %13, %12 : vector<16x128xf32>
    %15 = arith.mulf %9, %14 : vector<16x128xf32>
    %16 = arith.truncf %15 : vector<16x128xf32> to vector<16x128xbf16>
    %c0_7 = arith.constant 0 : index
    %c0_8 = arith.constant 0 : index
    %17 = vector.load %arg4[%c0_7, %c0_8] : memref<16x128xbf16, #tpu.memory_space<vmem>>, vector<16x128xbf16>
    tpu.vector_store %arg4[%c0_7, %c0_8], %16 {strides = array<i32>} : memref<16x128xbf16, #tpu.memory_space<vmem>>, vector<16x128xbf16>,
    return
  }
  func.func @transform_0(%arg0: i32) -> (i32, i32) {
    %c0_i32 = arith.constant 0 : i32
    %c0_i32_0 = arith.constant 0 : i32
    return %arg0, %c0_i32 : i32, i32
  }
  func.func @transform_1(%arg0: i32) -> (i32, i32) {
    %c0_i32 = arith.constant 0 : i32
    %c0_i32_0 = arith.constant 0 : i32
    %c0_i32_1 = arith.constant 0 : i32
    return %c0_i32, %c0_i32_0 : i32, i32
  }
  func.func @transform_2(%arg0: i32) -> (i32, i32) {
    %c0_i32 = arith.constant 0 : i32
    %c0_i32_0 = arith.constant 0 : i32
    %c0_i32_1 = arith.constant 0 : i32
    return %c0_i32, %c0_i32_0 : i32, i32
  }
  func.func @transform_3(%arg0: i32) -> (i32, i32) {
    %c0_i32 = arith.constant 0 : i32
    %c0_i32_0 = arith.constant 0 : i32
    return %arg0, %c0_i32 : i32, i32
  }
}

</mosaic_0001>

<bundles_post_ra>
// kernel: tile.13
= control target key start
LH: loop header
LB: loop body
LE: loop exit
PB: predicated region body
PF: predicated region fallthrough
CT: control target
= control target key end

     0   :  { %s28_s0 = inlined_call_operand.vmem [shape: f32[8], index: 0, kind: input, shape index: {}]   ;;  %s29_s1 = inlined_call_operand.vmem [shape: f32[16,8], index: 1, kind: output, shape index: {}]  }
   0x1   :  { %v4_v0 = vld [vmem:[%s28_s0] ss:$0 sm:$0xff] }
   0x2   :  { %5 = vst [vmem:[%s29_s1] sm:$0xff] %v4_v0  ;;  %8 = vst [vmem:[%s29_s1 + $0x8] sm:$0xff] %v4_v0 }

// kernel: tile.14
= control target key start
LH: loop header
LB: loop body
LE: loop exit
PB: predicated region body
PF: predicated region fallthrough
CT: control target
= control target key end

     0   :  { %s131_s10 = smov 120   ;;  %s132_s11 = smov 104   ;;  %vm3_vm0 = vcmask 64512   ;;  %vm9_vm1 = vcmask 1048512   ;;  %vm15_vm2 = vcmask 982912   ;;  %vm21_vm3 = vcmask 917312   ;;  %s207_s0 = inlined_call_operand.vmem [shape: f32[16,8], index: 0, kind: input, shape index: {}]   ;;  %s208_s1 = inlined_call_operand.vmem [shape: f32[1,128], index: 1, kind: output, shape index: {}]  }
   0x1   :  { %v101_v0 = vld [vmem:[%s207_s0 + $0xf] sm:$0x1]   ;;  %v103_v1 = vld [vmem:[%s207_s0 + $0xd] sm:$0x1]   ;;  %v102_v2 = vld [vmem:[%s207_s0 + $0xe] sm:$0x1]  }
   0x2   :  { %7 = vrot.lane.b32.xlu0 %v101_v0, %s131_s10  ;;  %19 = vrot.lane.b32.xlu1 %v103_v1, %s132_s11  ;;  %v104_v3 = vld [vmem:[%s207_s0 + $0xc] sm:$0x1]   ;;  %s133_s16 = smov 112   ;;  %s134_s17 = smov 96   ;;  %v105_v4 = vld [vmem:[%s207_s0 + $0xb] sm:$0x1]  }
   0x3   :  { %v106_v5 = vld [vmem:[%s207_s0 + $0xa] sm:$0x1]   ;;  %v2_v6 = vld [vmem:[%s207_s0] sm:$0x1]   ;;  %s135_s24 = smov 88   ;;  %s136_s25 = smov 80  }
   0x4   :  { %4 = vst.msk [vmem:[#allocation0] sm:$0x1] %vm3_vm0, %v2_v6   ;;  %v107_v7 = vld [vmem:[%s207_s0 + $0x9] sm:$0x1]   ;;  %v108_v8 = vld [vmem:[%s207_s0 + $0x8] sm:$0x1]  }
   0x5   :  { %s137_s30 = smov 72   ;;  %s138_s2 = smov 64   ;;  %v109_v9 = vld [vmem:[%s207_s0 + $0x7] sm:$0x1]   ;;  %v110_v10 = vld [vmem:[%s207_s0 + $0x6] sm:$0x1]  }
   0x6   :  { %13 = vrot.lane.b32.xlu0 %v102_v2, %s133_s16  ;;  %25 = vrot.lane.b32.xlu1 %v104_v3, %s134_s17  ;;  %s139_s7 = smov 56   ;;  %s140_s8 = smov 48   ;;  %v111_v11 = vld [vmem:[%s207_s0 + $0x5] sm:$0x1]   ;;  %v112_v12 = vld [vmem:[%s207_s0 + $0x4] sm:$0x1]  }
   0x7   :  { %s141_s13 = smov 40   ;;  %s142_s14 = smov 32   ;;  %v113_v13 = vld [vmem:[%s207_s0 + $0x3] sm:$0x1]   ;;  %v114_v14 = vld [vmem:[%s207_s0 + $0x2] sm:$0x1]  }
   0x8   :  { %s143_s19 = smov 24   ;;  %s144_s20 = smov 16   ;;  %v115_v15 = vld [vmem:[%s207_s0 + $0x1] sm:$0x1]   ;;  %vm27_vm4 = vcmask 851712   ;;  %vm33_vm5 = vcmask 786112  }
   0x9   :  { %s145_s0 = smov 8   ;;  %vm39_vm6 = vcmask 720512   ;;  %vm45_vm7 = vcmask 654912   ;;  %vm51_vm8 = vcmask 589312   ;;  %vm57_vm9 = vcmask 523712  }
   0xa   :  { %31 = vrot.lane.b32.xlu0 %v105_v4, %s135_s24  ;;  %37 = vrot.lane.b32.xlu1 %v106_v5, %s136_s25  ;;  %vm63_vm10 = vcmask 458112   ;;  %vm69_vm11 = vcmask 392512   ;;  %vm75_vm12 = vcmask 326912   ;;  %vm81_vm13 = vcmask 261312  }
   0xb   :  { %vm87_vm14 = vcmask 195712   ;;  %vm93_vm15 = vcmask 130112  }
   0xe   :  { %43 = vrot.lane.b32.xlu0 %v107_v7, %s137_s30  ;;  %49 = vrot.lane.b32.xlu1 %v108_v8, %s138_s2 }
  0x12   :  { %55 = vrot.lane.b32.xlu0 %v109_v9, %s139_s7  ;;  %61 = vrot.lane.b32.xlu1 %v110_v10, %s140_s8 }
  0x16   :  { %67 = vrot.lane.b32.xlu0 %v111_v11, %s141_s13  ;;  %73 = vrot.lane.b32.xlu1 %v112_v12, %s142_s14 }
  0x1a   :  { %79 = vrot.lane.b32.xlu0 %v113_v13, %s143_s19  ;;  %85 = vrot.lane.b32.xlu1 %v114_v14, %s144_s20 }
  0x1e   :  { %91 = vrot.lane.b32.xlu0 %v115_v15, %s145_s0 }
  0x74   :  { %v8_v16 = vpop.permute.xlu0 %7   ;;  %v20_v17 = vpop.permute.xlu1 %19  }
  0x75   :  { %10 = vst.msk [vmem:[#allocation0] sm:$0x1] %vm9_vm1, %v8_v16  }
  0x78   :  { %v14_v18 = vpop.permute.xlu0 %13   ;;  %v26_v19 = vpop.permute.xlu1 %25  }
  0x79   :  { %16 = vst.msk [vmem:[#allocation0] sm:$0x1] %vm15_vm2, %v14_v18  }
  0x7a   :  { %22 = vst.msk [vmem:[#allocation0] sm:$0x1] %vm21_vm3, %v20_v17  }
  0x7b   :  { %28 = vst.msk [vmem:[#allocation0] sm:$0x1] %vm27_vm4, %v26_v19  }
  0x7c   :  { %v32_v20 = vpop.permute.xlu0 %31   ;;  %v38_v21 = vpop.permute.xlu1 %37  }
  0x7d   :  { %34 = vst.msk [vmem:[#allocation0] sm:$0x1] %vm33_vm5, %v32_v20  }
  0x7e   :  { %40 = vst.msk [vmem:[#allocation0] sm:$0x1] %vm39_vm6, %v38_v21  }
  0x80   :  { %v44_v22 = vpop.permute.xlu0 %43   ;;  %v50_v23 = vpop.permute.xlu1 %49  }
  0x81   :  { %46 = vst.msk [vmem:[#allocation0] sm:$0x1] %vm45_vm7, %v44_v22  }
  0x82   :  { %52 = vst.msk [vmem:[#allocation0] sm:$0x1] %vm51_vm8, %v50_v23  }
  0x84   :  { %v56_v24 = vpop.permute.xlu0 %55   ;;  %v62_v25 = vpop.permute.xlu1 %61  }
  0x85   :  { %58 = vst.msk [vmem:[#allocation0] sm:$0x1] %vm57_vm9, %v56_v24  }
  0x86   :  { %64 = vst.msk [vmem:[#allocation0] sm:$0x1] %vm63_vm10, %v62_v25  }
  0x88   :  { %v68_v26 = vpop.permute.xlu0 %67   ;;  %v74_v27 = vpop.permute.xlu1 %73  }
  0x89   :  { %70 = vst.msk [vmem:[#allocation0] sm:$0x1] %vm69_vm11, %v68_v26  }
  0x8a   :  { %76 = vst.msk [vmem:[#allocation0] sm:$0x1] %vm75_vm12, %v74_v27  }
  0x8c   :  { %v80_v28 = vpop.permute.xlu0 %79   ;;  %v86_v29 = vpop.permute.xlu1 %85  }
  0x8d   :  { %82 = vst.msk [vmem:[#allocation0] sm:$0x1] %vm81_vm13, %v80_v28  }
  0x8e   :  { %88 = vst.msk [vmem:[#allocation0] sm:$0x1] %vm87_vm14, %v86_v29  }
  0x90   :  { %v92_v30 = vpop.permute.xlu0 %91  }
  0x91   :  { %94 = vst.msk [vmem:[#allocation0] sm:$0x1] %vm93_vm15, %v92_v30  }
  0x98   :  { %v98_v31 = vld [vmem:[#allocation0] sm:$0x1] }
  0x99   :  { %100 = vst [vmem:[%s208_s1] sm:$0x1] %v98_v31 }

// kernel: conv_block_forward.2
= control target key start
LH: loop header
LB: loop body
LE: loop exit
PB: predicated region body
PF: predicated region fallthrough
CT: control target
= control target key end

     0   :  { %s599_s12 = smov 0   ;;  %s690_s0 = inlined_call_operand.vmem [shape: bf16[2,18,72], index: 0, kind: input, shape index: {}]   ;;  %s691_s1 = inlined_call_operand.vmem [shape: bf16[216,128], index: 1, kind: input, shape index: {}]   ;;  %s692_s2 = inlined_call_operand.vmem [shape: bf16[32,128], index: 2, kind: output, shape index: {0}]   ;;  %s693_s3 = inlined_call_operand.vmem [shape: f32[2,8,128], index: 3, kind: output, shape index: {1}]  }
   0x1 LB: > { %s605_s13 = sadd.s32 4294967295, %s574_s12   ;;  %p505_p0 = scmp.ge.s32.totalorder %s574_s12, 1  ;;  %s574_s12 = sphi %s599_s12, %s14_s12  }
   0x2   : > { %p140_p1 = scmp.lt.s32.totalorder %s574_s12, 3 }
   0x4   : > { %p141_p2 = pnand %p505_p0, %p140_p1 }
   0x5   : > { %p168_p3 = scmp.lt.s32.totalorder (!%p141_p2), %s605_s13, 1  ;;  %v576_v0 = vmov (!%p141_p2), 0   ;;  %v554_v1 = vld [vmem:[%s691_s1] sm:$0xff] (!%p141_p2)   ;;  %v555_v2 = vld [vmem:[%s691_s1 + $0x8] sm:$0xff] (!%p141_p2)   ;;  %v556_v3 = vld [vmem:[%s691_s1 + $0x10] sm:$0xff] (!%p141_p2)   ;;  %vm214_vm1 = vcmask (!%p141_p2), 1046528  }
   0x6   : > { %144 = sbr.rel (%p141_p2) target bundleno = 382 (0x17e), region = 28  ;;  %342 = vmatprep.subr.bf16.mxu0 (!%p141_p2), %v576_v0  ;;  %vm196_vm0 = vsmask.f32 (!%p141_p2), 7424  ;;  %v557_v13 = vld [vmem:[%s691_s1 + $0x18] sm:$0xff] (!%p141_p2)   ;;  %v558_v19 = vld [vmem:[%s691_s1 + $0x20] sm:$0xff] (!%p141_p2)   ;;  %s577_s29 = smov (!%p141_p2), 72  }
   0x7   : > { %343 = vmatpush1.bf16.msra.mxu0 (!%p141_p2), %v554_v1  ;;  %v559_v22 = vld [vmem:[%s691_s1 + $0x28] sm:$0xff] (!%p141_p2)   ;;  %s578_s5 = smov (!%p141_p2), 16   ;;  %v560_v23 = vld [vmem:[%s691_s1 + $0x30] sm:$0xff] (!%p141_p2)   ;;  %v561_v24 = vld [vmem:[%s691_s1 + $0x38] sm:$0xff] (!%p141_p2)   ;;  %vm338_vm2 = vcmask (!%p141_p2), 1043456   ;;  %vm224_vm3 = vcmask (!%p141_p2), 130048  }
   0x8   : > { %344 = vmatprep.subr.bf16.mxu0 (!%p141_p2), %v576_v0  ;;  %v562_v25 = vld [vmem:[%s691_s1 + $0x40] sm:$0xff] (!%p141_p2)   ;;  %v563_v26 = vld [vmem:[%s691_s1 + $0x48] sm:$0xff] (!%p141_p2)   ;;  %v564_v27 = vld [vmem:[%s691_s1 + $0x50] sm:$0xff] (!%p141_p2)   ;;  %vm335_vm4 = vcmask (!%p141_p2), 719872   ;;  %vm220_vm5 = vcmask (!%p141_p2), 588800   ;;  %s507_s25 = sshll.u32 (!%p141_p2), %s605_s13, 1 }
   0x9   : > { %v565_v28 = vld [vmem:[%s691_s1 + $0x58] sm:$0xff] (!%p141_p2)   ;;  %v566_v29 = vld [vmem:[%s691_s1 + $0x60] sm:$0xff] (!%p141_p2)   ;;  %v567_v30 = vld [vmem:[%s691_s1 + $0x68] ss:$0 sps:$4 sm:$0xff] (!%p141_p2)   ;;  %p174_p4 = scmp.lt.s32.totalorder (!%p141_p2), %s507_s25, 3  ;;  %vm409_vm6 = vcmask (!%p141_p2), 1040384  }
   0xa   : > { %v340_v31 = vsel (!%p141_p2), %vm338_vm2, %v567_v30, 0  ;;  %vm411_vm7 = vcmask (!%p141_p2), 1041408  }
   0xb   : > { %345 = vmatpush1.bf16.msra.mxu0 (!%p141_p2), %v555_v2 }
   0xc   : > { %346 = vmatprep.subr.bf16.mxu0 (!%p141_p2), %v576_v0 }
   0xd   : > { %s615_s16 = scalar_select %p168_p3, %s605_s13, 1 }
   0xe   : > { %s695_s25 = smov (!%p174_p4, %s507_s25), 3 }
   0xf   : > { %s539_s19 = smul.u32 12, %s615_s16  ;;  %347 = vmatpush1.bf16.msra.mxu0 %v556_v3  ;;  %s508_s26 = sshll.u32 %s695_s25, 2 }
  0x10   : > { %348 = vmatprep.subr.bf16.mxu0 %v576_v0  ;;  %s509_s13 = sshll.u32 %s615_s16, 3 }
  0x11   : > { %s172_s22 = scalar_lea.vmem %s690_s0, %s539_s19 }
  0x12   : > { %v184_v4 = vld [vmem:[%s172_s22] sm:$0xf]  ;;  %v185_v5 = vld [vmem:[%s172_s22 + $0x4] sm:$0xf] }
  0x13   : > { %v628_v6 = vcombine.low %v184_v4, %v185_v5  ;;  %v552_v7 = vld [vmem:[%s172_s22 + $0x8] ss:$0 sps:$4 sm:$0x11]   ;;  %v187_v8 = vld [vmem:[%s172_s22] sm:$0xe]  ;;  %349 = vmatpush1.bf16.msra.mxu0 %v557_v13 }
  0x14   : > { %v205_v11 = vshll.u32 %v552_v7, 16  ;;  %v512_v12 = vcombine.low %v187_v8, %v185_v5  ;;  %v216_v18 = vrot.slane %v552_v7, 1  ;;  %350 = vmatprep.subr.bf16.mxu0 %v576_v0 }
  0x15   : > { %v198_v9 = vshrl.u32 %v628_v6, 16  ;;  %v200_v10 = vshll.u32 %v628_v6, 16 }
  0x16   : > { %v207_v15 = vrot.slane %v205_v11, 1  ;;  %v215_v17 = vrot.slane %v512_v12, 1 }
  0x17   : > { %v202_v14 = vrot.slane %v200_v10, 1  ;;  %351 = vmatpush1.bf16.msra.mxu0 %v558_v19 }
  0x18   : > { %v217_v21 = vsel %vm214_vm1, %v215_v17, %v216_v18  ;;  %352 = vmatprep.subr.bf16.mxu0 %v576_v0 }
  0x19   : > { %v203_v16 = vor.u32 %v202_v14, %v198_v9 }
  0x1b   : > { %v208_v20 = vsel %vm196_vm0, %v203_v16, %v207_v15  ;;  %353 = vmatpush1.bf16.msra.mxu0 %v559_v22 }
  0x1c   : > { %209 = vrot.lane.b32.xlu0 %v208_v20, %s577_s29  ;;  %354 = vmatprep.subr.bf16.mxu0 %v576_v0  ;;  %s177_s29 = scalar_lea.vmem %s692_s2, %s508_s26 }
  0x1f   : > { %355 = vmatpush1.bf16.msra.mxu0 %v560_v23 }
  0x20   : > { %218 = vrot.lane.b32.xlu0 %v217_v21, %s578_s5  ;;  %356 = vmatprep.subr.bf16.mxu0 %v576_v0  ;;  %s182_s5 = scalar_lea.vmem %s693_s3, %s509_s13 }
  0x23   : > { %357 = vmatpush1.bf16.msra.mxu0 %v561_v24 }
  0x24   : > { %358 = vmatprep.subr.bf16.mxu0 %v576_v0 }
  0x27   : > { %359 = vmatpush1.bf16.msra.mxu0 %v562_v25 }
  0x28   : > { %360 = vmatprep.subr.bf16.mxu0 %v576_v0 }
  0x2b   : > { %361 = vmatpush1.bf16.msra.mxu0 %v563_v26 }
  0x2c   : > { %362 = vmatprep.subr.bf16.mxu0 %v576_v0 }
  0x2f   : > { %363 = vmatpush1.bf16.msra.mxu0 %v564_v27 }
  0x30   : > { %364 = vmatprep.subr.bf16.mxu0 %v576_v0 }
  0x33   : > { %365 = vmatpush1.bf16.msra.mxu0 %v565_v28 }
  0x34   : > { %366 = vmatprep.subr.bf16.mxu0 %v576_v0 }
  0x37   : > { %367 = vmatpush1.bf16.msra.mxu0 %v566_v29 }
  0x38   : > { %368 = vmatprep.subr.bf16.mxu0 %v576_v0 }
  0x3b   : > { %369 = vmatpush1.bf16.msra.mxu0 %v340_v31 }
  0x8e   : > { %v210_v32 = vpop.permute.xlu0 %209 }
  0x8f   : > { %v222_v35 = vsel %vm220_vm5, %v628_v6, %v210_v32 }
  0x92   : > { %v219_v33 = vpop.permute.xlu0 %218 }
  0x93   : > { %v226_v34 = vsel %vm224_vm3, %v210_v32, %v219_v33 }
  0x94   : > { %527 = vmatprep.mubr.msk.bf16.mxu0 %vm335_vm4, %v226_v34 }
  0x95   : > { %375 = vmatmul.mubr.bf16.vlgmr.msra.gmra.mrb[0].mxu0 %v222_v35 }
 0x168   : > { %v376_v36 = vpop.f32.mrb[0].mxu0 }
 0x169   : > { %v378_v37 = vpop.f32.mrb[1].mxu0  ;;  %v400_v39 = vmul.f32 %v376_v36, %v376_v36 }
 0x16a   : > { %v379_v38 = vpop.f32.mrb[2].mxu0 }
 0x16b   : > { %v537_v40 = vpack.c.bf16 %v379_v38, %v376_v36  ;;  %v393_v41 = vadd.f32 %v379_v38, %v376_v36  ;;  %v401_v42 = vmul.f32 %v379_v38, %v379_v38  ;;  %v381_v43 = vpop.f32.mrb[3].mxu0 }
 0x16d   : > { %538 = vst [vmem:[%s177_s29] sm:$0xff] %v537_v40   ;;  %v394_v44 = vrot.slane %v393_v41, 4  ;;  %v402_v45 = vadd.f32 %v401_v42, %v400_v39 }
 0x16f   : > { %v395_v46 = vadd.f32 %v394_v44, %v393_v41  ;;  %v403_v47 = vrot.slane %v402_v45, 4 }
 0x171   : > { %v396_v48 = vrot.slane %v395_v46, 2  ;;  %v404_v49 = vadd.f32 %v403_v47, %v402_v45 }
 0x173   : > { %v397_v50 = vadd.f32 %v396_v48, %v395_v46  ;;  %v405_v51 = vrot.slane %v404_v49, 2 }
 0x175   : > { %v398_v52 = vrot.slane %v397_v50, 1  ;;  %v406_v53 = vadd.f32 %v405_v51, %v404_v49 }
 0x177   : > { %v407_v54 = vrot.slane %v406_v53, 1  ;;  %v399_v55 = vadd.f32 %v398_v52, %v397_v50 }
 0x179   : > { %v408_v56 = vadd.f32 %v407_v54, %v406_v53 }
 0x17b   : > { %v410_v57 = vsel %vm409_vm6, %v399_v55, %v408_v56 }
 0x17c   : > { %v412_v58 = vsel %vm411_vm7, %v410_v57, 0.0 }
 0x17d   : > { %413 = vst [vmem:[%s182_s5] sm:$0xff] %v412_v58 }
 0x17e PF: > { %s14_s12 = sadd.s32 1, %s574_s12  }
 0x17f   : > { %p11_p5 = scmp.ge.s32.totalorder %s14_s12, 4  }
 0x181   :  { %13 = sbr.rel (!%p11_p5) target bundleno = 1 (0x1), region = 70 }

// kernel: conv_block_forward.3
= control target key start
LH: loop header
LB: loop body
LE: loop exit
PB: predicated region body
PF: predicated region fallthrough
CT: control target
= control target key end

     0   :  { %s338_s12 = smov 0   ;;  %s361_s0 = inlined_call_operand.vmem [shape: bf16[32,128], index: 0, kind: input, shape index: {}, may-alias: {0,3}]   ;;  %s362_s1 = inlined_call_operand.vmem [shape: f32[1,128], index: 1, kind: input, shape index: {}]   ;;  %s363_s2 = inlined_call_operand.vmem [shape: f32[1,128], index: 2, kind: input, shape index: {}]   ;;  %s364_s3 = inlined_call_operand.vmem [shape: bf16[32,128], index: 3, kind: output, shape index: {}, may-alias: {0,3}]  }
   0x1 LB: > { %s272_s13 = sadd.s32 4294967295, %s316_s12   ;;  %p276_p0 = scmp.ge.s32.totalorder %s316_s12, 1  ;;  %s316_s12 = sphi %s338_s12, %s13_s12  }
   0x2   : > { %p138_p1 = scmp.lt.s32.totalorder %s316_s12, 3 }
   0x4   : > { %p139_p2 = pnand %p276_p0, %p138_p1 }
   0x5   : > { %s277_s14 = sshll.u32 (!%p139_p2), %s272_s13, 1  ;;  %v281_v1 = vld [vmem:[%s362_s1] ss:$0 sm:$0xff] (!%p139_p2) }
   0x6   : > { %142 = sbr.rel (%p139_p2) target bundleno = 44 (0x2c), region = 32  ;;  %p163_p3 = scmp.lt.s32.totalorder (!%p139_p2), %s277_s14, 3  ;;  %v282_v4 = vld [vmem:[%s363_s2] ss:$0 sm:$0xff] (!%p139_p2) }
   0xd   : > { %s366_s14 = smov (!%p163_p3, %s277_s14), 3 }
   0xe   : > { %s278_s15 = sshll.u32 %s366_s14, 2 }
   0xf   : > { %s166_s18 = scalar_lea.vmem %s361_s0, %s278_s15  ;;  %s172_s25 = scalar_lea.vmem %s364_s3, %s278_s15 }
  0x10   : > { %v290_v0 = vld [vmem:[%s166_s18] sm:$0xff]  }
  0x11   : > { %v291_v2 = vunpack.c.l.bf16 %v290_v0  ;;  %v292_v3 = vunpack.c.h.bf16 %v290_v0 }
  0x13   : > { %v185_v5 = vmul.f32 %v291_v2, %v281_v1  ;;  %v186_v6 = vmul.f32 %v292_v3, %v281_v1 }
  0x15   : > { %v194_v7 = vadd.f32 %v282_v4, %v185_v5  ;;  %v195_v8 = vadd.f32 %v282_v4, %v186_v6 }
  0x17   : > { %v198_v9 = vmul.f32 0.70710677, %v194_v7  ;;  %v199_v10 = vmul.f32 0.70710677, %v195_v8  ;;  %v196_v11 = vmul.f32 0.5, %v194_v7  ;;  %v197_v13 = vmul.f32 0.5, %v195_v8 }
  0x19   : > { %306 = verf.f32 %v198_v9 }
  0x1a   : > { %308 = verf.f32 %v199_v10 }
  0x23   : > { %v307_v12 = vpop.eup %306 }
  0x24   : > { %v309_v14 = vpop.eup %308  ;;  %v202_v15 = vadd.f32 1.0, %v307_v12 }
  0x25   : > { %v203_v16 = vadd.f32 1.0, %v309_v14 }
  0x26   : > { %v204_v17 = vmul.f32 %v202_v15, %v196_v11 }
  0x27   : > { %v205_v18 = vmul.f32 %v203_v16, %v197_v13 }
  0x29   : > { %v296_v19 = vpack.c.bf16 %v205_v18, %v204_v17 }
  0x2b   : > { %297 = vst [vmem:[%s172_s25] sm:$0xff] %v296_v19  }
  0x2c PF: > { %s13_s12 = sadd.s32 1, %s316_s12  }
  0x2d   : > { %p10_p4 = scmp.ge.s32.totalorder %s13_s12, 4  }
  0x2f   :  { %12 = sbr.rel (!%p10_p4) target bundleno = 1 (0x1), region = 62 }

</bundles_post_ra>
